<compile_context>
chip_gen: v7x
topology: tpu7x:2x2x1
jax: 0.10.0
libtpu: 0.0.40
codegen_flags: <defaults>
</compile_context>

<pallas_src>
import functools

import jax
import jax.numpy as jnp
from jax.experimental import pallas as pl
from jax.experimental.pallas import tpu as pltpu


# Stand-in for IdxMaps.START_ID in the reference implementation.
START_ID = 0

_LANE = 128
_MIB = 1024 * 1024


def _round_up(x: int, m: int) -> int:
    return (x + m - 1) // m * m


def _crf_kernel(scores_ref, trans_ref, out_ref, *, ntags: int):
    """scores_ref: (R, T); trans_ref: (1, T*T); out_ref: (R, T*T).

    out[r, i*T + j] = scores[r, j] + trans[0, i*T + j].
    The emission term is the input row tiled T times along lanes, built with
    log2(T) doublings (array concatenated with itself) -> O(log T) lane
    shift/selects per output vreg instead of O(T).
    """
    T = ntags
    TT = T * T
    rep = scores_ref[...]                       # (R, T)
    width = T
    while width < TT:                           # trace-time loop, ceil(log2 T) iters
        rep = jnp.concatenate([rep, rep], axis=-1)
        width *= 2
    if width != TT:
        rep = rep[:, :TT]                       # static prefix slice (overshoot case)
    # rep[r, k] == scores[r, k mod T]  for all k < TT  ->  rep[r, i*T + j] = scores[r, j]
    out_ref[...] = rep + trans_ref[...]         # (R, TT) + (1, TT) broadcast over rows


def _pallas_crf_2d(scores2d: jax.Array, trans_row: jax.Array, T: int) -> jax.Array:
    rows = scores2d.shape[0]
    TT = T * T
    fp = 4  # float32 bytes

    # --- Padded-size VMEM accounting (bytes per block row) -----------------
    in_row = _round_up(T, _LANE) * fp                 # input rows pad to 128 lanes
    out_row = _round_up(TT, _LANE) * fp               # output rows pad to k*128 lanes
    tmp_row = 0                                       # doubling-stage temporaries
    w = T
    while w < TT:
        w *= 2
        tmp_row += _round_up(w, _LANE) * fp
    tmp_row += out_row                                # slack for final slice/add temp

    per_row = 2 * (in_row + out_row) + tmp_row        # 2x = double-buffered pipeline
    budget = 22 * _MIB                                # safe on v5e/v6e/v7x scoped VMEM
    r_budget = max(8, (budget // per_row) // 8 * 8)

    # Keep several grid steps once there is enough work (pipeline overlap /
    # megacore sharding on v7x), but never shrink blocks below ~2048 rows.
    r_steps = _round_up(pl.cdiv(rows, 8), 8)
    tile_r = min(r_budget, max(r_steps, 2048))
    if tile_r >= rows:
        tile_r = rows                                 # single full-extent block
    grid = (pl.cdiv(rows, tile_r),)

    needed = per_row * tile_r
    vmem_limit = int(min(44 * _MIB, max(24 * _MIB, needed + needed // 2)))

    return pl.pallas_call(
        functools.partial(_crf_kernel, ntags=T),
        out_shape=jax.ShapeDtypeStruct((rows, TT), scores2d.dtype),
        grid=grid,
        in_specs=[
            # Full last-dim extent on both inputs -> contiguous HBM reads.
            pl.BlockSpec((tile_r, T), lambda r: (r, 0)),
            # Constant block index -> transitions fetched once, never re-DMA'd.
            pl.BlockSpec((1, TT), lambda r: (0, 0)),
        ],
        out_specs=pl.BlockSpec((tile_r, TT), lambda r: (r, 0)),
        compiler_params=pltpu.CompilerParams(
            dimension_semantics=("parallel",),
            vmem_limit_bytes=vmem_limit,
        ),
    )(scores2d, trans_row)


def crf_features(scores: jax.Array, transitions: jax.Array,
                 *, use_pallas: bool | None = None) -> jax.Array:
    """Pallas equivalent of CRF.forward.

    scores      : (B, S, T)
    transitions : (T, T)
    returns     : (B, S, T, T) with out[b,t,i,j] = scores[b,t,j] + transitions[i,j]
    """
    B, S, T = scores.shape
    assert transitions.shape == (T, T)
    scores = scores.astype(jnp.float32)
    transitions = transitions.astype(jnp.float32)
    TT = T * T

    out_bytes = B * S * TT * 4
    if use_pallas is None:
        # A 1-step pallas_call on a few KB is pure fixed overhead; let XLA do it.
        use_pallas = out_bytes >= 1 * _MIB
    if not use_pallas:
        return scores[:, :, None, :] + transitions[None, None, :, :]

    scores2d = scores.reshape(B * S, T)        # metadata-only reshape
    trans_row = transitions.reshape(1, TT)     # metadata-only reshape
    out2d = _pallas_crf_2d(scores2d, trans_row, T)
    return out2d.reshape(B, S, T, T)           # metadata-only reshape


def init_transitions(key, ntags: int) -> jax.Array:
    """Mirror the PyTorch __init__: uniform(-0.1, 0.1), column START_ID = -10000."""
    t = jax.random.uniform(key, (ntags, ntags), jnp.float32, minval=-0.1, maxval=0.1)
    t = t.at[:, START_ID].set(-10000.0)
    return t


def crf_features_ref(scores: jax.Array, transitions: jax.Array) -> jax.Array:
    """Pure-JAX reference for correctness checking."""
    return scores[:, :, None, :] + transitions[None, None, :, :]


# TODO(synk): forward_alg / viterbi / tags_score (the CRF recursion consumers)
# are separate static methods outside the requested forward pass; fusing this
# broadcast-add into them would avoid materializing (B,S,T,T) entirely.


if __name__ == "__main__":
    key = jax.random.PRNGKey(0)
    k_trans, k_scores, k2, k3, k4, k5 = jax.random.split(key, 6)

    # 1) Small module-consistent shapes (B=2, S=8, T=8).
    B, S, T = 2, 8, 8
    transitions = init_transitions(k_trans, T)
    scores = jax.random.normal(k_scores, (B, S, T), jnp.float32)
    ref = crf_features_ref(scores, transitions)

    out_auto = jax.block_until_ready(crf_features(scores, transitions))          # XLA path
    assert out_auto.shape == (B, S, T, T)
    assert jnp.allclose(out_auto, ref, atol=1e-6), "mismatch (auto/XLA path)"

    out_pl = jax.block_until_ready(crf_features(scores, transitions, use_pallas=True))
    assert jnp.allclose(out_pl, ref, atol=1e-6), "mismatch (forced Pallas, tiny)"

    # 2) Large enough to take the Pallas path naturally: multi-step grid,
    #    partial final block, odd tag count (T=9 -> TT=81, doubling overshoot).
    B2, S2, T2 = 5, 1000, 9
    tr2 = init_transitions(k2, T2)
    sc2 = jax.random.normal(k3, (B2, S2, T2), jnp.float32)
    out2 = jax.block_until_ready(crf_features(sc2, tr2))
    assert jnp.allclose(out2, crf_features_ref(sc2, tr2), atol=1e-6), \
        "mismatch (Pallas, multi-step grid)"

    # 3) Forced Pallas on awkward shapes: rows not a multiple of 8, T=5.
    B3, S3, T3 = 3, 7, 5
    tr3 = init_transitions(k4, T3)
    sc3 = jax.random.normal(k5, (B3, S3, T3), jnp.float32)
    out3 = jax.block_until_ready(crf_features(sc3, tr3, use_pallas=True))
    assert jnp.allclose(out3, crf_features_ref(sc3, tr3), atol=1e-6), \
        "mismatch (forced Pallas, odd rows)"

    print("KERNEL_OK")
</pallas_src>

<mosaic_0001>
module attributes {stable_mosaic.version = 11 : i64} {
  func.func @_crf_kernel(%arg0: i32, %arg1: memref<16x8xf32, #tpu.memory_space<vmem>>, %arg2: memref<1x64xf32, #tpu.memory_space<vmem>>, %arg3: memref<16x64xf32, #tpu.memory_space<vmem>>) attributes {dimension_semantics = [#tpu.dimension_semantics<parallel>], iteration_bounds = array<i64: 1>, scalar_prefetch = 0 : i64, scratch_operands = 0 : i64, tpu.core_type = #tpu.core_type<tc>, window_params = [{transform_indices = @transform_0, window_bounds = array<i64: 16, 8>}, {pipeline_mode = #tpu.pipeline_mode<synchronous>, transform_indices = @transform_1, window_bounds = array<i64: 1, 64>}, {transform_indices = @transform_2, window_bounds = array<i64: 16, 64>}]} {
    %c0 = arith.constant 0 : index
    %c0_0 = arith.constant 0 : index
    %0 = vector.load %arg1[%c0, %c0_0] : memref<16x8xf32, #tpu.memory_space<vmem>>, vector<16x8xf32>
    %1 = tpu.concatenate %0, %0 in 1 : vector<16x8xf32>, vector<16x8xf32> -> vector<16x16xf32>
    %2 = tpu.concatenate %1, %1 in 1 : vector<16x16xf32>, vector<16x16xf32> -> vector<16x32xf32>
    %3 = tpu.concatenate %2, %2 in 1 : vector<16x32xf32>, vector<16x32xf32> -> vector<16x64xf32>
    %c0_1 = arith.constant 0 : index
    %c0_2 = arith.constant 0 : index
    %4 = vector.load %arg2[%c0_1, %c0_2] : memref<1x64xf32, #tpu.memory_space<vmem>>, vector<1x64xf32>
    %5 = vector.broadcast %4 : vector<1x64xf32> to vector<16x64xf32>
    %6 = arith.addf %3, %5 : vector<16x64xf32>
    %c0_3 = arith.constant 0 : index
    %c0_4 = arith.constant 0 : index
    %7 = vector.load %arg3[%c0_3, %c0_4] : memref<16x64xf32, #tpu.memory_space<vmem>>, vector<16x64xf32>
    tpu.vector_store %arg3[%c0_3, %c0_4], %6 {strides = array<i32>} : memref<16x64xf32, #tpu.memory_space<vmem>>, vector<16x64xf32>,
    return
  }
  func.func @transform_0(%arg0: i32) -> (i32, i32) {
    %c0_i32 = arith.constant 0 : i32
    %c0_i32_0 = arith.constant 0 : i32
    return %arg0, %c0_i32 : i32, i32
  }
  func.func @transform_1(%arg0: i32) -> (i32, i32) {
    %c0_i32 = arith.constant 0 : i32
    %c0_i32_0 = arith.constant 0 : i32
    %c0_i32_1 = arith.constant 0 : i32
    return %c0_i32, %c0_i32_0 : i32, i32
  }
  func.func @transform_2(%arg0: i32) -> (i32, i32) {
    %c0_i32 = arith.constant 0 : i32
    %c0_i32_0 = arith.constant 0 : i32
    return %arg0, %c0_i32 : i32, i32
  }
}

</mosaic_0001>

<bundles_post_ra>
// kernel: tpu_custom_call.1
= control target key start
LH: loop header
LB: loop body
LE: loop exit
PB: predicated region body
PF: predicated region fallthrough
CT: control target
= control target key end

     0   :  { %s105_s11 = smov 8   ;;  %s149_s0 = inlined_call_operand.vmem [shape: f32[16,8], index: 0, kind: input, shape index: {}]   ;;  %s150_s1 = inlined_call_operand.vmem [shape: f32[1,64], index: 1, kind: input, shape index: {}]   ;;  %s151_s2 = inlined_call_operand.hbm [shape: f32[16,64], index: 2, kind: output, shape index: {}]  }
   0x1   :  { %v12_v0 = vld [vmem:[%s149_s0] sm:$0xff] }
   0x2   :  { %16 = vrot.lane.b32.xlu0 %v12_v0, %s105_s11 }
   0x3   :  { %7 = vsyncpa [#allocation3], 0  ;;  %v13_v1 = vld [vmem:[%s149_s0 + $0x8] sm:$0xff]  ;;  %vm22_vm0 = vcmask 64512   ;;  %s106_s14 = smov 16   ;;  %vm33_vm1 = vcmask 130048  }
   0x4   :  { %s107_s15 = smov 32   ;;  %vm44_vm2 = vcmask 261120   ;;  %v75_v10 = vld [vmem:[%s150_s1] ss:$0 sm:$0xff]  ;;  %vm56_vm3 = vcmask 523264   ;;  %s108_s17 = smov [#allocation2]  }
   0x5   :  { %s64_s18 = sshll.u32 %s108_s17, 4  ;;  %s65_s18 = int_to_ptr.vmem [resolvable:$true] %s64_s18 }
   0x6   :  { %18 = vrot.lane.b32.xlu0 %v13_v1, %s105_s11  ;;  %s81_s19 = scalar_lea.vmem %s65_s18, 256  ;;  %p86_p1 = scmp.lt.s32.totalorder %s65_s18, %s65_s18 }
   0x7   :  { %p82_p0 = scmp.ne.s32.totalorder %s65_s18, %s81_s19  ;;  %p87_p2 = scmp.lt.s32.totalorder %s81_s19, %s81_s19 }
   0x9   :  { %p88_p3 = por %p87_p2, %p86_p1 }
   0xb   :  { %p89_p4 = pnand %p88_p3, %p82_p0 }
  0x74   :  { %v17_v2 = vpop.permute.xlu0 %16 }
  0x75   :  { %v23_v3 = vsel %vm22_vm0, %v12_v0, %v17_v2 }
  0x76   :  { %27 = vrot.lane.b32.xlu1 %v23_v3, %s106_s14 }
  0x78   :  { %v19_v4 = vpop.permute.xlu0 %18 }
  0x79   :  { %v24_v5 = vsel %vm22_vm0, %v13_v1, %v19_v4 }
  0x7a   :  { %29 = vrot.lane.b32.xlu1 %v24_v5, %s106_s14 }
  0xe8   :  { %v28_v6 = vpop.permute.xlu1 %27 }
  0xe9   :  { %v34_v7 = vsel %vm33_vm1, %v23_v3, %v28_v6 }
  0xea   :  { %38 = vrot.lane.b32.xlu0 %v34_v7, %s107_s15 }
  0xec   :  { %v30_v8 = vpop.permute.xlu1 %29 }
  0xed   :  { %v35_v9 = vsel %vm33_vm1, %v24_v5, %v30_v8 }
  0xee   :  { %40 = vrot.lane.b32.xlu1 %v35_v9, %s107_s15 }
 0x15c   :  { %v39_v11 = vpop.permute.xlu0 %38 }
 0x15d   :  { %v45_v12 = vsel %vm44_vm2, %v34_v7, %v39_v11 }
 0x15e   :  { %v54_v13 = vadd.f32 %v75_v10, %v45_v12 }
 0x160   :  { %57 = vst.msk [vmem:[#allocation2] sm:$0xff] %vm56_vm3, %v54_v13  ;;  %v41_v14 = vpop.permute.xlu1 %40 }
 0x161   :  { %v46_v15 = vsel %vm44_vm2, %v35_v9, %v41_v14 }
 0x162   :  { %v55_v16 = vadd.f32 %v75_v10, %v46_v15 }
 0x164   :  { %58 = vst.msk [vmem:[#allocation2 + $0x8] sm:$0xff] %vm56_vm3, %v55_v16 }
 0x165   :  { %92 = shalt.err (!%p89_p4)
}
 0x166   :  { %s93_s21 = scalar_lea.hbm %s151_s2, 256 }
 0x167   :  { %p94_p5 = scmp.ne.s32.totalorder %s151_s2, %s93_s21  ;;  %p97_p6 = scmp.lt.u32.totalorder %s93_s21, %s151_s2 }
 0x169   :  { %p99_p7 = pnand %p97_p6, %p94_p5 }
 0x16b   :  { %102 = shalt.err (!%p99_p7)
}
 0x16c   :  { %s109_s26 = smov 128  }
 0x16d   :  { %70 = dma.vmem_to_hbm [thread:$0]  %s65_s18, 256, %s151_s2, [#allocation3], %s109_s26, %s109_s26, %s105_s11  }
 0x16e   :  { %103 = dma.done.wait [#allocation3], 256  }
 0x16f   :  { %104 = vsyncadd [#allocation3], 4294967040 }
 0x170   :  { %74 = vsyncpa [#allocation3], 1 }

</bundles_post_ra>
